<compile_context>
chip_gen: v7x
topology: tpu7x:2x2x1
jax: 0.10.0
libtpu: 0.0.40
codegen_flags: <defaults>
</compile_context>

<pallas_src>
import jax
import jax.numpy as jnp
import numpy as np
from jax.experimental import pallas as pl
from jax.experimental.pallas import tpu as pltpu


def _make_pe_kernel(num_embeddings, out_dtype):
    """Kernel body: x_ref (8, tc) f32 -> o_ref (K, 8, tc) out_dtype."""
    n = int(num_embeddings)

    def kernel(x_ref, o_ref):
        x = x_ref[...]                                  # (8, tc) f32
        theta = jnp.float32(np.pi) * x                  # pi * x
        s = jnp.sin(theta)                              # sin(pi x)   (EUP)
        c = jnp.cos(theta)                              # cos(pi x)   (EUP)
        o_ref[0, :, :] = s.astype(out_dtype)
        o_ref[1, :, :] = c.astype(out_dtype)
        if n > 1:
            # Double angle: sin/cos(2*pi*x); then sum-angle recurrence for
            # sin/cos(2*pi*i*x), i = 2..N-1 (4 mul + 2 add per harmonic, VPU).
            s2 = 2.0 * s * c
            c2 = 1.0 - 2.0 * s * s
            sk, ck = s2, c2
            o_ref[2, :, :] = sk.astype(out_dtype)
            o_ref[3, :, :] = ck.astype(out_dtype)
            for i in range(2, n):
                sk, ck = sk * c2 + ck * s2, ck * c2 - sk * s2
                o_ref[2 * i, :, :] = sk.astype(out_dtype)
                o_ref[2 * i + 1, :, :] = ck.astype(out_dtype)
        o_ref[2 * n, :, :] = x.astype(out_dtype)        # identity feature row

    return kernel


def positional_encoding_lane_dense(x, num_embeddings, *, tile_lanes=8192,
                                   out_dtype=jnp.float32):
    """Lane-dense positional encoding.

    x: (b, 3, 1) float.  Returns (out, m) where out has shape (K, 8, C),
    K = 2*num_embeddings + 1, and the flat sample j = 0..m-1 (row-major over
    (b, 3)) lives at out[:, j // C, j % C].  This layout is the intended
    interface for a fused downstream (concat + MLP) kernel.
    """
    b, three, one = x.shape
    assert three == 3 and one == 1
    m = b * 3
    k = 2 * num_embeddings + 1

    # Lane tile: multiple of 128.  Clamp so that the grid has >= 2 steps when
    # the problem is big enough (v7x megacore), never below 128 lanes.
    half_cols = pl.cdiv(pl.cdiv(m, 8), 2)
    half_cols = pl.cdiv(half_cols, 128) * 128
    tc = max(128, min(int(tile_lanes), half_cols))
    samples_per_step = 8 * tc
    grid_m = pl.cdiv(m, samples_per_step)
    m_pad = grid_m * samples_per_step
    c = m_pad // 8

    x_flat = x.reshape(m).astype(jnp.float32)
    x2d = jnp.pad(x_flat, (0, m_pad - m)).reshape(8, c)

    out_itemsize = jnp.dtype(out_dtype).itemsize
    block_in = 8 * tc * 4
    block_out = k * 8 * tc * out_itemsize
    vmem_bytes = max(2 * (block_in + block_out) + (1 << 20), 4 << 20)

    cost = pl.CostEstimate(
        flops=int(m_pad * (4 + 8 * max(num_embeddings - 1, 0))),
        transcendentals=int(2 * m_pad),
        bytes_accessed=int(4 * m_pad + out_itemsize * k * m_pad),
    )

    out = pl.pallas_call(
        _make_pe_kernel(num_embeddings, out_dtype),
        out_shape=jax.ShapeDtypeStruct((k, 8, c), out_dtype),
        grid=(grid_m,),
        in_specs=[pl.BlockSpec((8, tc), lambda i: (0, i))],
        out_specs=pl.BlockSpec((k, 8, tc), lambda i: (0, 0, i)),
        compiler_params=pltpu.CompilerParams(
            dimension_semantics=("parallel",),
            vmem_limit_bytes=int(vmem_bytes),
        ),
        cost_estimate=cost,
    )(x2d)
    return out, m


def positional_encoding(x, num_embeddings, **kwargs):
    """Module-compatible wrapper: (b, 3, 1) -> (b, 3, 2*num_embeddings + 1).

    NOTE: the repack below exists only to match the PyTorch interface for the
    correctness check; fused consumers should use positional_encoding_lane_dense
    and consume the (K, 8, C) slab directly (avoids re-moving all data through
    a 14x lane-padded (b, 3, 9) HBM layout).
    """
    b = x.shape[0]
    k = 2 * num_embeddings + 1
    out, m = positional_encoding_lane_dense(x, num_embeddings, **kwargs)
    return out.reshape(k, -1)[:, :m].T.reshape(b, 3, k)


def positional_encoding_ref(x, num_embeddings):
    """Pure-JAX reference mirroring the PyTorch forward."""
    embs = [jnp.sin(jnp.pi * x), jnp.cos(jnp.pi * x)]
    for i in range(1, num_embeddings):
        embs.append(jnp.sin(jnp.pi * 2 * i * x))
        embs.append(jnp.cos(jnp.pi * 2 * i * x))
    embs.append(x)
    return jnp.concatenate(embs, axis=-1)


# TODO(synk): HashTable.query (spatial hash + embedding gather + trilinear
# interpolation), the 3-layer MLP decoder and Camera.get_samples (class not
# provided) are not lowered to Pallas here; only the PositionalEncoding stage
# of HashNeRF is implemented as a kernel.

if __name__ == "__main__":
    num_embeddings = 4
    b = 2
    key = jax.random.PRNGKey(0)
    x = jax.random.normal(key, (b, 3, 1), dtype=jnp.float32)

    out = positional_encoding(x, num_embeddings)
    out = jax.block_until_ready(out)

    ref = positional_encoding_ref(x, num_embeddings)
    assert out.shape == (b, 3, 2 * num_embeddings + 1), out.shape
    np.testing.assert_allclose(np.asarray(out), np.asarray(ref),
                               rtol=2e-5, atol=2e-5)

    # Larger multi-tile smoke test exercising the pipelined, multi-step grid.
    b2 = 4096
    x2 = jax.random.normal(jax.random.PRNGKey(1), (b2, 3, 1), dtype=jnp.float32)
    out2 = jax.block_until_ready(
        positional_encoding(x2, num_embeddings, tile_lanes=512))
    ref2 = positional_encoding_ref(x2, num_embeddings)
    np.testing.assert_allclose(np.asarray(out2), np.asarray(ref2),
                               rtol=2e-5, atol=2e-5)

    print("KERNEL_OK")
</pallas_src>

<mosaic_0001>
module attributes {stable_mosaic.version = 11 : i64} {
  func.func @kernel(%arg0: i32, %arg1: memref<8x128xf32, #tpu.memory_space<vmem>>, %arg2: memref<9x8x128xf32, #tpu.memory_space<vmem>>) attributes {dimension_semantics = [#tpu.dimension_semantics<parallel>], iteration_bounds = array<i64: 1>, scalar_prefetch = 0 : i64, scratch_operands = 0 : i64, tpu.core_type = #tpu.core_type<tc>, window_params = [{transform_indices = @transform_0, window_bounds = array<i64: 8, 128>}, {transform_indices = @transform_1, window_bounds = array<i64: 9, 8, 128>}]} {
    %c0 = arith.constant 0 : index
    %c0_0 = arith.constant 0 : index
    %0 = vector.load %arg1[%c0, %c0_0] : memref<8x128xf32, #tpu.memory_space<vmem>>, vector<8x128xf32>
    %cst = arith.constant 3.14159274 : f32
    %1 = vector.broadcast %cst : f32 to vector<8x128xf32>
    %2 = arith.mulf %1, %0 : vector<8x128xf32>
    %3 = math.sin %2 : vector<8x128xf32>
    %4 = math.cos %2 : vector<8x128xf32>
    %c0_1 = arith.constant 0 : index
    %c0_2 = arith.constant 0 : index
    %c0_3 = arith.constant 0 : index
    %5 = vector.load %arg2[%c0_1, %c0_2, %c0_3] : memref<9x8x128xf32, #tpu.memory_space<vmem>>, vector<1x8x128xf32>
    %6 = vector.shape_cast %5 : vector<1x8x128xf32> to vector<8x128xf32>
    %7 = vector.shape_cast %3 : vector<8x128xf32> to vector<1x8x128xf32>
    tpu.vector_store %arg2[%c0_1, %c0_2, %c0_3], %7 {strides = array<i32>} : memref<9x8x128xf32, #tpu.memory_space<vmem>>, vector<1x8x128xf32>,
    %c1 = arith.constant 1 : index
    %c0_4 = arith.constant 0 : index
    %c0_5 = arith.constant 0 : index
    %8 = vector.load %arg2[%c1, %c0_4, %c0_5] : memref<9x8x128xf32, #tpu.memory_space<vmem>>, vector<1x8x128xf32>
    %9 = vector.shape_cast %8 : vector<1x8x128xf32> to vector<8x128xf32>
    %10 = vector.shape_cast %4 : vector<8x128xf32> to vector<1x8x128xf32>
    tpu.vector_store %arg2[%c1, %c0_4, %c0_5], %10 {strides = array<i32>} : memref<9x8x128xf32, #tpu.memory_space<vmem>>, vector<1x8x128xf32>,
    %cst_6 = arith.constant 2.000000e+00 : f32
    %11 = vector.broadcast %cst_6 : f32 to vector<8x128xf32>
    %12 = arith.mulf %11, %3 : vector<8x128xf32>
    %13 = arith.mulf %12, %4 : vector<8x128xf32>
    %cst_7 = arith.constant 2.000000e+00 : f32
    %14 = vector.broadcast %cst_7 : f32 to vector<8x128xf32>
    %15 = arith.mulf %14, %3 : vector<8x128xf32>
    %16 = arith.mulf %15, %3 : vector<8x128xf32>
    %cst_8 = arith.constant 1.000000e+00 : f32
    %17 = vector.broadcast %cst_8 : f32 to vector<8x128xf32>
    %18 = arith.subf %17, %16 : vector<8x128xf32>
    %c2 = arith.constant 2 : index
    %c0_9 = arith.constant 0 : index
    %c0_10 = arith.constant 0 : index
    %19 = vector.load %arg2[%c2, %c0_9, %c0_10] : memref<9x8x128xf32, #tpu.memory_space<vmem>>, vector<1x8x128xf32>
    %20 = vector.shape_cast %19 : vector<1x8x128xf32> to vector<8x128xf32>
    %21 = vector.shape_cast %13 : vector<8x128xf32> to vector<1x8x128xf32>
    tpu.vector_store %arg2[%c2, %c0_9, %c0_10], %21 {strides = array<i32>} : memref<9x8x128xf32, #tpu.memory_space<vmem>>, vector<1x8x128xf32>,
    %c3 = arith.constant 3 : index
    %c0_11 = arith.constant 0 : index
    %c0_12 = arith.constant 0 : index
    %22 = vector.load %arg2[%c3, %c0_11, %c0_12] : memref<9x8x128xf32, #tpu.memory_space<vmem>>, vector<1x8x128xf32>
    %23 = vector.shape_cast %22 : vector<1x8x128xf32> to vector<8x128xf32>
    %24 = vector.shape_cast %18 : vector<8x128xf32> to vector<1x8x128xf32>
    tpu.vector_store %arg2[%c3, %c0_11, %c0_12], %24 {strides = array<i32>} : memref<9x8x128xf32, #tpu.memory_space<vmem>>, vector<1x8x128xf32>,
    %25 = arith.mulf %13, %18 : vector<8x128xf32>
    %26 = arith.mulf %18, %13 : vector<8x128xf32>
    %27 = arith.addf %25, %26 : vector<8x128xf32>
    %28 = arith.mulf %18, %18 : vector<8x128xf32>
    %29 = arith.mulf %13, %13 : vector<8x128xf32>
    %30 = arith.subf %28, %29 : vector<8x128xf32>
    %c4 = arith.constant 4 : index
    %c0_13 = arith.constant 0 : index
    %c0_14 = arith.constant 0 : index
    %31 = vector.load %arg2[%c4, %c0_13, %c0_14] : memref<9x8x128xf32, #tpu.memory_space<vmem>>, vector<1x8x128xf32>
    %32 = vector.shape_cast %31 : vector<1x8x128xf32> to vector<8x128xf32>
    %33 = vector.shape_cast %27 : vector<8x128xf32> to vector<1x8x128xf32>
    tpu.vector_store %arg2[%c4, %c0_13, %c0_14], %33 {strides = array<i32>} : memref<9x8x128xf32, #tpu.memory_space<vmem>>, vector<1x8x128xf32>,
    %c5 = arith.constant 5 : index
    %c0_15 = arith.constant 0 : index
    %c0_16 = arith.constant 0 : index
    %34 = vector.load %arg2[%c5, %c0_15, %c0_16] : memref<9x8x128xf32, #tpu.memory_space<vmem>>, vector<1x8x128xf32>
    %35 = vector.shape_cast %34 : vector<1x8x128xf32> to vector<8x128xf32>
    %36 = vector.shape_cast %30 : vector<8x128xf32> to vector<1x8x128xf32>
    tpu.vector_store %arg2[%c5, %c0_15, %c0_16], %36 {strides = array<i32>} : memref<9x8x128xf32, #tpu.memory_space<vmem>>, vector<1x8x128xf32>,
    %37 = arith.mulf %27, %18 : vector<8x128xf32>
    %38 = arith.mulf %30, %13 : vector<8x128xf32>
    %39 = arith.addf %37, %38 : vector<8x128xf32>
    %40 = arith.mulf %30, %18 : vector<8x128xf32>
    %41 = arith.mulf %27, %13 : vector<8x128xf32>
    %42 = arith.subf %40, %41 : vector<8x128xf32>
    %c6 = arith.constant 6 : index
    %c0_17 = arith.constant 0 : index
    %c0_18 = arith.constant 0 : index
    %43 = vector.load %arg2[%c6, %c0_17, %c0_18] : memref<9x8x128xf32, #tpu.memory_space<vmem>>, vector<1x8x128xf32>
    %44 = vector.shape_cast %43 : vector<1x8x128xf32> to vector<8x128xf32>
    %45 = vector.shape_cast %39 : vector<8x128xf32> to vector<1x8x128xf32>
    tpu.vector_store %arg2[%c6, %c0_17, %c0_18], %45 {strides = array<i32>} : memref<9x8x128xf32, #tpu.memory_space<vmem>>, vector<1x8x128xf32>,
    %c7 = arith.constant 7 : index
    %c0_19 = arith.constant 0 : index
    %c0_20 = arith.constant 0 : index
    %46 = vector.load %arg2[%c7, %c0_19, %c0_20] : memref<9x8x128xf32, #tpu.memory_space<vmem>>, vector<1x8x128xf32>
    %47 = vector.shape_cast %46 : vector<1x8x128xf32> to vector<8x128xf32>
    %48 = vector.shape_cast %42 : vector<8x128xf32> to vector<1x8x128xf32>
    tpu.vector_store %arg2[%c7, %c0_19, %c0_20], %48 {strides = array<i32>} : memref<9x8x128xf32, #tpu.memory_space<vmem>>, vector<1x8x128xf32>,
    %c8 = arith.constant 8 : index
    %c0_21 = arith.constant 0 : index
    %c0_22 = arith.constant 0 : index
    %49 = vector.load %arg2[%c8, %c0_21, %c0_22] : memref<9x8x128xf32, #tpu.memory_space<vmem>>, vector<1x8x128xf32>
    %50 = vector.shape_cast %49 : vector<1x8x128xf32> to vector<8x128xf32>
    %51 = vector.shape_cast %0 : vector<8x128xf32> to vector<1x8x128xf32>
    tpu.vector_store %arg2[%c8, %c0_21, %c0_22], %51 {strides = array<i32>} : memref<9x8x128xf32, #tpu.memory_space<vmem>>, vector<1x8x128xf32>,
    return
  }
  func.func @transform_0(%arg0: i32) -> (i32, i32) {
    %c0_i32 = arith.constant 0 : i32
    %c0_i32_0 = arith.constant 0 : i32
    return %c0_i32, %arg0 : i32, i32
  }
  func.func @transform_1(%arg0: i32) -> (i32, i32, i32) {
    %c0_i32 = arith.constant 0 : i32
    %c0_i32_0 = arith.constant 0 : i32
    %c0_i32_1 = arith.constant 0 : i32
    return %c0_i32, %c0_i32_0, %arg0 : i32, i32, i32
  }
}

</mosaic_0001>

<bundles_post_ra>
// kernel: tpu_custom_call.1
= control target key start
LH: loop header
LB: loop body
LE: loop exit
PB: predicated region body
PF: predicated region fallthrough
CT: control target
= control target key end

     0   :  { %6 = vsyncpa [#allocation3], 0  ;;  %s418_s0 = inlined_call_operand.hbm [shape: f32[8,128], index: 0, kind: input, shape index: {}]   ;;  %s419_s1 = inlined_call_operand.hbm [shape: f32[9,8,128], index: 1, kind: output, shape index: {}]  }
   0x1   :  { %7 = vsyncpa [#allocation4], 0  ;;  %s353_s6 = smov [#allocation2]   ;;  %s305_s10 = scalar_lea.hbm %s418_s0, 128 }
   0x2   :  { %s14_s7 = sshll.u32 %s353_s6, 4  ;;  %p306_p0 = scmp.ne.s32.totalorder %s418_s0, %s305_s10  ;;  %s15_s7 = int_to_ptr.vmem [resolvable:$true] %s14_s7 }
   0x3   :  { %p309_p1 = scmp.lt.u32.totalorder %s305_s10, %s418_s0 }
   0x5   :  { %p311_p2 = pnand %p309_p1, %p306_p0 }
   0x7   :  { %314 = shalt.err (!%p311_p2)
}
   0x8   :  { %s315_s15 = scalar_lea.vmem %s15_s7, 128  ;;  %p320_p4 = scmp.lt.s32.totalorder %s15_s7, %s15_s7 }
   0x9   :  { %p316_p3 = scmp.ne.s32.totalorder %s15_s7, %s315_s15  ;;  %p321_p5 = scmp.lt.s32.totalorder %s315_s15, %s315_s15 }
   0xb   :  { %p322_p6 = por %p321_p5, %p320_p4 }
   0xd   :  { %p323_p7 = pnand %p322_p6, %p316_p3 }
   0xf   :  { %326 = shalt.err (!%p323_p7)
}
  0x10   :  { %17 = dma.hbm_to_vmem [thread:$0]  %s418_s0, 128, %s15_s7, [#allocation3]  }
  0x11   :  { %349 = dma.done.wait [#allocation3], 128  }
  0x12   :  { %350 = vsyncadd [#allocation3], 4294967168  ;;  %v21_v0 = vld [vmem:[#allocation2] sm:$0xff]  ;;  %v354_v13 = vmov 683565275   ;;  %s360_s0 = smov [#allocation5]  }
  0x13   :  { %v385_v1 = vmul.f32 3.1415927, %v21_v0  ;;  %261 = vst [vmem:[#allocation5 + $0x40] sm:$0xff] %v21_v0  ;;  %v355_v15 = vmov 2475754826   ;;  %s267_s18 = sshll.u32 %s360_s0, 4  ;;  %s268_s18 = int_to_ptr.vmem [resolvable:$true] %s267_s18 }
  0x14   :  { %v356_v17 = vmov 2131351028   ;;  %v357_v19 = vmov 2102212464   ;;  %v358_v21 = vmov 920167782   ;;  %p332_p9 = scmp.lt.s32.totalorder %s268_s18, %s268_s18 }
  0x15   :  { %v26_v2 = vand.u32 2139095040, %v385_v1  ;;  %v23_v4 = vand.u32 2147483647, %v385_v1  ;;  %v359_v28 = vmov 1326507024   ;;  %vm25_vm7 = vcmp.lt.s32.totalorder %v385_v1, 0 }
  0x16   :  { %vm115_vm15 = vweird.f32 %v385_v1  ;;  %s327_s19 = scalar_lea.vmem %s268_s18, 1152 }
  0x17   :  { %v27_v3 = vshrl.u32 %v26_v2, 23  ;;  %v30_v7 = vand.u32 8388607, %v23_v4  ;;  %vm24_vm8 = vcmp.le.f32.partialorder %v23_v4, 0.7853982  ;;  %p328_p8 = scmp.ne.s32.totalorder %s268_s18, %s327_s19  ;;  %p333_p10 = scmp.lt.s32.totalorder %s327_s19, %s327_s19 }
  0x19   :  { %v279_v5 = vadd.s32 4294967169, %v27_v3  ;;  %v31_v10 = vor.u32 8388608, %v30_v7  ;;  %p334_p11 = por %p333_p10, %p332_p9 }
  0x1b   :  { %v33_v6 = vadd.s32 1, %v279_v5  ;;  %v71_v30 = vshll.u32 %v31_v10, 8  ;;  %p335_p12 = pnand %p334_p11, %p328_p8 }
  0x1d   :  { %vm34_vm0 = vcmp.gt.s32.totalorder %v33_v6, 0 }
  0x1e   :  { %v35_v8 = vsel %vm34_vm0, %v33_v6, 0 }
  0x1f   :  { %v37_v9 = vand.u32 31, %v35_v8  ;;  %v36_v11 = vshrl.u32 %v35_v8, 5 }
  0x21   :  { %v38_v12 = vsub.s32 32, %v37_v9  ;;  %v40_v14 = vshll.u32 %v354_v13, %v37_v9  ;;  %v43_v16 = vshll.u32 %v355_v15, %v37_v9  ;;  %v46_v18 = vshll.u32 %v356_v17, %v37_v9 }
  0x22   :  { %v49_v20 = vshll.u32 %v357_v19, %v37_v9  ;;  %v52_v22 = vshll.u32 %v358_v21, %v37_v9  ;;  %vm55_vm1 = vcmp.lt.s32.totalorder %v36_v11, 1  ;;  %vm58_vm2 = vcmp.lt.s32.totalorder %v36_v11, 4 }
  0x23   :  { %v39_v23 = vshrl.u32 %v354_v13, %v38_v12  ;;  %v41_v24 = vshrl.u32 %v355_v15, %v38_v12  ;;  %v44_v25 = vshrl.u32 %v356_v17, %v38_v12  ;;  %v47_v26 = vshrl.u32 %v357_v19, %v38_v12 }
  0x24   :  { %v50_v27 = vshrl.u32 %v358_v21, %v38_v12  ;;  %v53_v29 = vshrl.u32 %v359_v28, %v38_v12  ;;  %vm56_vm3 = vcmp.lt.s32.totalorder %v36_v11, 2  ;;  %vm57_vm4 = vcmp.lt.s32.totalorder %v36_v11, 3 }
  0x25   :  { %v42_v31 = vor.u32 %v41_v24, %v40_v14  ;;  %v45_v32 = vor.u32 %v44_v25, %v43_v16  ;;  %v48_v33 = vor.u32 %v47_v26, %v46_v18 }
  0x26   :  { %v51_v34 = vor.u32 %v50_v27, %v49_v20  ;;  %v54_v35 = vor.u32 %v53_v29, %v52_v22 }
  0x27   :  { %v59_v36 = vsel %vm55_vm1, %v39_v23, %v42_v31  ;;  %v60_v37 = vsel %vm58_vm2, %v48_v33, 2102212464  ;;  %v63_v38 = vsel %vm55_vm1, %v42_v31, %v45_v32  ;;  %v67_v39 = vsel %vm55_vm1, %v45_v32, %v48_v33 }
  0x28   :  { %v61_v40 = vsel %vm57_vm4, %v45_v32, %v60_v37  ;;  %v64_v41 = vsel %vm58_vm2, %v51_v34, 920167782  ;;  %v68_v42 = vsel %vm58_vm2, %v54_v35, 1326507024 }
  0x29   :  { %v65_v43 = vsel %vm57_vm4, %v48_v33, %v64_v41  ;;  %v69_v44 = vsel %vm57_vm4, %v51_v34, %v68_v42  ;;  %v62_v45 = vsel %vm56_vm3, %v59_v36, %v61_v40 }
  0x2a   :  { %v66_v46 = vsel %vm56_vm3, %v63_v38, %v65_v43  ;;  %v70_v47 = vsel %vm56_vm3, %v67_v39, %v69_v44  ;;  %v78_v52 = vmul.u32 %v71_v30, %v62_v45 }
  0x2b   :  { %v391_v48 = vmul.u32.u64.low %v71_v30, %v70_v47  ;;  %v392_v49 = vmul.u32.u64.high %v71_v30, %v70_v47, %v391_v48  ;;  %v394_v50 = vmul.u32.u64.low %v71_v30, %v66_v46  ;;  %v395_v51 = vmul.u32.u64.high %v71_v30, %v66_v46, %v394_v50 }
  0x2d   :  { %vm80_vm5 = vc.u32 %v392_v49, %v394_v50  ;;  %v81_v53 = vadd.s32 1, %v395_v51  ;;  %v79_v0 = vadd.s32 %v394_v50, %v392_v49 }
  0x2f   :  { %v82_v54 = vsel %vm80_vm5, %v81_v53, %v395_v51 }
  0x30   :  { %v83_v55 = vadd.s32 %v82_v54, %v78_v52 }
  0x32   :  { %v84_v56 = vadd.s32 536870912, %v83_v55 }
  0x34   :  { %v85_v57 = vshrl.u32 %v84_v56, 30 }
  0x36   :  { %v86_v58 = vshll.u32 %v85_v57, 30  ;;  %v109_v14 = vsub.s32 4, %v85_v57 }
  0x38   :  { %v87_v59 = vsub.s32 %v83_v55, %v86_v58  ;;  %v110_v17 = vsel %vm25_vm7, %v109_v14, %v85_v57 }
  0x39   :  { %v112_v20 = vsel %vm24_vm8, 0, %v110_v17 }
  0x3a   :  { %v89_v60 = vsub.s32 0, %v87_v59  ;;  %v116_v21 = vadd.s32 3, %v112_v20  ;;  %v220_v23 = vand.u32 3, %v112_v20 }
  0x3c   :  { %v280_v61 = vmin.u32 %v89_v60, %v87_v59  ;;  %v117_v22 = vand.u32 3, %v116_v21  ;;  %vm225_vm10 = vcmp.eq.s32.totalorder %v220_v23, 2  ;;  %vm222_vm12 = vcmp.eq.s32.totalorder %v220_v23, 0 }
  0x3d   :  { %vm221_vm14 = vcmp.lt.s32.totalorder %v220_v23, 2 }
  0x3e   :  { %v91_v62 = vclz %v280_v61  ;;  %vm122_vm9 = vcmp.eq.s32.totalorder %v117_v22, 2  ;;  %vm119_vm11 = vcmp.eq.s32.totalorder %v117_v22, 0  ;;  %vm118_vm13 = vcmp.lt.s32.totalorder %v117_v22, 2 }
  0x40   :  { %v281_v63 = vadd.s32 4294967294, %v91_v62 }
  0x42   :  { %vm282_vm6 = vcmp.lt.s32.totalorder %v281_v63, 0 }
  0x43   :  { %v94_v2 = vsel %vm282_vm6, 0, %v281_v63 }
  0x44   :  { %v95_v3 = vsub.s32 32, %v94_v2  ;;  %v96_v5 = vshll.u32 %v87_v59, %v94_v2  ;;  %v99_v6 = vsub.s32 4294967266, %v94_v2 }
  0x46   :  { %v97_v7 = vshrl.u32 %v79_v0, %v95_v3  ;;  %v100_v8 = vadd.s32 127, %v99_v6 }
  0x48   :  { %v98_v9 = vor.u32 %v97_v7, %v96_v5  ;;  %v101_v10 = vshll.u32 %v100_v8, 23 }
  0x4a   :  { %v102_v11 = vor.u32 4788187, %v101_v10  ;;  %v105_v12 = vcvt.s32.f32 %v98_v9 }
  0x4c   :  { %v103_v13 = vand.u32 2147483647, %v102_v11 }
  0x4e   :  { %v106_v15 = vmul.f32 %v105_v12, %v103_v13 }
  0x50   :  { %v107_v16 = vxor.u32 2147483648, %v106_v15 }
  0x52   :  { %v108_v18 = vsel %vm25_vm7, %v107_v16, %v106_v15 }
  0x53   :  { %v111_v19 = vsel %vm24_vm8, %v385_v1, %v108_v18 }
  0x54   :  { %301 = vcosq.f32 %v111_v19 }
  0x55   :  { %303 = vsinq.f32 %v111_v19 }
  0x5e   :  { %v302_v24 = vpop.eup %301 }
  0x5f   :  { %v304_v25 = vpop.eup %303  ;;  %v123_v26 = vxor.u32 2147483648, %v302_v24 }
  0x60   :  { %v120_v4 = vxor.u32 2147483648, %v304_v25 }
  0x61   :  { %v124_v27 = vsel %vm122_vm9, %v123_v26, %v304_v25  ;;  %v227_v28 = vsel %vm225_vm10, %v123_v26, %v304_v25 }
  0x62   :  { %v121_v29 = vsel %vm119_vm11, %v302_v24, %v120_v4  ;;  %v224_v30 = vsel %vm222_vm12, %v302_v24, %v120_v4 }
  0x63   :  { %v125_v31 = vsel %vm118_vm13, %v121_v29, %v124_v27  ;;  %v228_v32 = vsel %vm221_vm14, %v224_v30, %v227_v28 }
  0x64   :  { %v126_v33 = vsel %vm115_vm15, nan, %v125_v31  ;;  %v229_v34 = vsel %vm115_vm15, nan, %v228_v32 }
  0x65   :  { %230 = vst [vmem:[#allocation5] sm:$0xff] %v126_v33  ;;  %232 = vst [vmem:[#allocation5 + $0x8] sm:$0xff] %v229_v34  ;;  %v233_v35 = vmul.f32 2.0, %v126_v33 }
  0x67   :  { %v234_v36 = vmul.f32 %v233_v35, %v229_v34  ;;  %v235_v37 = vmul.f32 %v233_v35, %v126_v33 }
  0x69   :  { %v236_v38 = vsub.f32 1.0, %v235_v37  ;;  %238 = vst [vmem:[#allocation5 + $0x10] sm:$0xff] %v234_v36  ;;  %v244_v39 = vmul.f32 %v234_v36, %v234_v36 }
  0x6b   :  { %240 = vst [vmem:[#allocation5 + $0x18] sm:$0xff] %v236_v38  ;;  %v241_v40 = vmul.f32 %v236_v38, %v234_v36  ;;  %v243_v41 = vmul.f32 %v236_v38, %v236_v38 }
  0x6d   :  { %v242_v1 = vadd.f32 %v241_v40, %v241_v40  ;;  %v245_v42 = vsub.f32 %v243_v41, %v244_v39 }
  0x6f   :  { %247 = vst [vmem:[#allocation5 + $0x20] sm:$0xff] %v242_v1  ;;  %249 = vst [vmem:[#allocation5 + $0x28] sm:$0xff] %v245_v42  ;;  %v250_v43 = vmul.f32 %v242_v1, %v236_v38  ;;  %v251_v44 = vmul.f32 %v245_v42, %v234_v36  ;;  %v253_v45 = vmul.f32 %v245_v42, %v236_v38 }
  0x70   :  { %v254_v46 = vmul.f32 %v242_v1, %v234_v36 }
  0x71   :  { %v252_v47 = vadd.f32 %v251_v44, %v250_v43 }
  0x72   :  { %v255_v48 = vsub.f32 %v253_v45, %v254_v46 }
  0x73   :  { %257 = vst [vmem:[#allocation5 + $0x30] sm:$0xff] %v252_v47 }
  0x74   :  { %259 = vst [vmem:[#allocation5 + $0x38] sm:$0xff] %v255_v48 }
  0x75   :  { %338 = shalt.err (!%p335_p12)
}
  0x76   :  { %s339_s22 = scalar_lea.hbm %s419_s1, 1152 }
  0x77   :  { %p340_p13 = scmp.ne.s32.totalorder %s419_s1, %s339_s22  ;;  %p343_p0 = scmp.lt.u32.totalorder %s339_s22, %s419_s1 }
  0x79   :  { %p345_p1 = pnand %p343_p0, %p340_p13 }
  0x7b   :  { %348 = shalt.err (!%p345_p1)
}
  0x7c   :  { %s361_s27 = smov 128   ;;  %s362_s28 = smov 8  }
  0x7d   :  { %273 = dma.vmem_to_hbm [thread:$0]  %s268_s18, 1152, %s419_s1, [#allocation4], %s361_s27, %s361_s27, %s362_s28  }
  0x7e   :  { %351 = dma.done.wait [#allocation4], 1152  }
  0x7f   :  { %352 = vsyncadd [#allocation4], 4294966144 }
  0x80   :  { %277 = vsyncpa [#allocation3], 1 }
  0x81   :  { %278 = vsyncpa [#allocation4], 1 }

</bundles_post_ra>
